<compile_context>
chip_gen: v7x
topology: tpu7x:2x2x1
jax: 0.10.0
libtpu: 0.0.40
codegen_flags: <defaults>
</compile_context>

<pallas_src>
import math

import jax
import jax.numpy as jnp
from jax import lax
from jax.experimental import pallas as pl
from jax.experimental.pallas import tpu as pltpu


def _make_mvn_kernel(D: int, d_for_norm: int):
    """Build the kernel for a fixed (static) dimension D / normalization d."""
    log_norm_const = float(d_for_norm) * math.log(2.0 * math.pi)

    def kernel(x_ref, mean_ref, cov_ref, out_ref, A_ref, b_ref):
        # x_ref: (D, Bt)  mean_ref: (D, 1)  cov_ref: (D, D)  out_ref: (1, Bt)
        # A_ref: (D, D) f32 scratch         b_ref: (D, Bt) f32 scratch
        x_m = (x_ref[...].astype(jnp.float32)
               - mean_ref[...].astype(jnp.float32))          # (D, Bt)
        A_ref[...] = cov_ref[...].astype(jnp.float32)
        b_ref[...] = x_m

        row_ids = lax.broadcasted_iota(jnp.int32, (D, 1), 0)  # hoisted
        det = jnp.ones((1, 1), jnp.float32)

        # Pivot-free Gauss-Jordan elimination (valid for SPD covariance),
        # solving cov @ sol = x_m for the whole lane batch in place in VMEM.
        # Static Python loop -> every slice below is a static slice.
        # TODO(synk): np.linalg.solve/det use LU with partial pivoting; this
        # assumes a well-conditioned SPD covariance.
        # TODO(synk): for D >~ 256 switch to a blocked Cholesky (panel factor
        # + MXU trailing-submatrix GEMM); this rank-1 update path is pure VPU.
        for k in range(D):
            A = A_ref[...]                   # (D, D)
            b = b_ref[...]                   # (D, Bt)
            prow = A[k:k + 1, :]             # (1, D)  pivot row
            brow = b[k:k + 1, :]             # (1, Bt) rhs row k
            colk = A[:, k:k + 1]             # (D, 1)  pivot column
            pivot = prow[:, k:k + 1]         # (1, 1)  A[k, k]

            # EUP approx reciprocal + one Newton refinement (~f32 accuracy).
            r = pl.reciprocal(pivot, approx=True)
            r = r * (2.0 - pivot * r)

            is_k = row_ids == k
            m = jnp.where(is_k, 0.0, colk * r)       # multipliers, row k -> 0
            A_new = A - m * prow
            b_new = b - m * brow
            A_ref[...] = jnp.where(is_k, A_new * r, A_new)
            b_ref[...] = jnp.where(is_k, b_new * r, b_new)

            det = det * pivot
            # TODO(synk): accumulate in log-space for very large D / badly
            # scaled covariances (running product can over/underflow f32).

        # Per-sample quadratic form (cov^{-1} x_m) . x_m  -> (1, Bt)
        q = jnp.sum(b_ref[...] * x_m, axis=0, keepdims=True)

        log_det = jnp.log(det)                         # one EUP log total
        log_res = -0.5 * q - 0.5 * (log_norm_const + log_det)
        out_ref[...] = jnp.exp(log_res).astype(out_ref.dtype)

    return kernel


def multivariate_normal_pallas_batched(xs, d, mean, covariance, *, tile=128):
    """Batched MVN density. xs: (B, D) samples -> (B,) f32 densities."""
    B, D = xs.shape
    assert mean.shape == (D,) and covariance.shape == (D, D)

    n_blocks = pl.cdiv(B, tile)
    B_pad = n_blocks * tile

    # Lane-dense slab: samples along the 128-lane axis, D on sublanes.
    x_slab = jnp.pad(xs.T, ((0, 0), (0, B_pad - B)))   # (D, B_pad)
    mean_col = mean.reshape(D, 1)

    kernel = _make_mvn_kernel(D, int(d))

    out = pl.pallas_call(
        kernel,
        out_shape=jax.ShapeDtypeStruct((1, B_pad), jnp.float32),
        grid_spec=pltpu.PrefetchScalarGridSpec(
            num_scalar_prefetch=0,
            grid=(n_blocks,),
            in_specs=[
                pl.BlockSpec((D, tile), lambda i: (0, i)),   # x slab tile
                pl.BlockSpec((D, 1), lambda i: (0, 0)),      # mean (shared)
                pl.BlockSpec((D, D), lambda i: (0, 0)),      # covariance
            ],
            out_specs=pl.BlockSpec((1, tile), lambda i: (0, i)),
            scratch_shapes=[
                pltpu.VMEM((D, D), jnp.float32),      # A (in-place GJ)
                pltpu.VMEM((D, tile), jnp.float32),   # b slab
            ],
        ),
        compiler_params=pltpu.CompilerParams(
            dimension_semantics=("parallel",)),        # shards TCs on v7x
    )(x_slab, mean_col, covariance)
    return out[0, :B]


def multivariate_normal_pallas(x, d, mean, covariance):
    """Single-sample forward matching the PyTorch module's semantics."""
    D = int(x.shape[0])
    out = multivariate_normal_pallas_batched(x.reshape(1, D), d, mean,
                                             covariance)
    return out[0]


def _reference(x, d, mean, covariance):
    x_m = x - mean
    return (1.0 / jnp.sqrt((2.0 * jnp.pi) ** d * jnp.linalg.det(covariance))
            * jnp.exp(-jnp.dot(jnp.linalg.solve(covariance, x_m), x_m) / 2.0))


if __name__ == "__main__":
    D = 8
    B = 200   # pads to 256 -> grid of 2 lane-dense tiles
    key = jax.random.PRNGKey(0)
    kx, km, kc, kb = jax.random.split(key, 4)

    mean = jax.random.normal(km, (D,), dtype=jnp.float32)
    M = jax.random.normal(kc, (D, D), dtype=jnp.float32)
    # SPD, well-conditioned covariance (deterministic, built in-script).
    covariance = M @ M.T + float(D) * jnp.eye(D, dtype=jnp.float32)

    # Single-sample path (matches the nn.Module forward signature).
    x = jax.random.normal(kx, (D,), dtype=jnp.float32)
    out1 = jax.block_until_ready(
        multivariate_normal_pallas(x, D, mean, covariance))
    with jax.default_matmul_precision("highest"):
        ref1 = _reference(x, D, mean, covariance)
    assert jnp.isfinite(out1)
    assert jnp.allclose(out1, ref1, rtol=1e-3, atol=1e-30), (out1, ref1)

    # Batched, lane-dense path (the throughput entry point).
    xs = jax.random.normal(kb, (B, D), dtype=jnp.float32)
    outB = jax.block_until_ready(
        multivariate_normal_pallas_batched(xs, D, mean, covariance))
    with jax.default_matmul_precision("highest"):
        refB = jax.vmap(lambda xi: _reference(xi, D, mean, covariance))(xs)
    assert bool(jnp.all(jnp.isfinite(outB)))
    assert jnp.allclose(outB, refB, rtol=1e-3, atol=1e-30), (outB, refB)

    print("KERNEL_OK")
</pallas_src>

<mosaic_0001>
module attributes {stable_mosaic.version = 11 : i64} {
  func.func @kernel(%arg0: i32, %arg1: memref<8x128xf32, #tpu.memory_space<vmem>>, %arg2: memref<8x1xf32, #tpu.memory_space<vmem>>, %arg3: memref<8x8xf32, #tpu.memory_space<vmem>>, %arg4: memref<1x128xf32, #tpu.memory_space<vmem>>, %arg5: memref<8x8xf32, #tpu.memory_space<vmem>>, %arg6: memref<8x128xf32, #tpu.memory_space<vmem>>) attributes {dimension_semantics = [#tpu.dimension_semantics<parallel>], iteration_bounds = array<i64: 1>, scalar_prefetch = 0 : i64, scratch_operands = 2 : i64, tpu.core_type = #tpu.core_type<tc>, window_params = [{transform_indices = @transform_0, window_bounds = array<i64: 8, 128>}, {pipeline_mode = #tpu.pipeline_mode<synchronous>, transform_indices = @transform_1, window_bounds = array<i64: 8, 1>}, {pipeline_mode = #tpu.pipeline_mode<synchronous>, transform_indices = @transform_2, window_bounds = array<i64: 8, 8>}, {transform_indices = @transform_3, window_bounds = array<i64: 1, 128>}]} {
    %c0 = arith.constant 0 : index
    %c0_0 = arith.constant 0 : index
    %0 = vector.load %arg1[%c0, %c0_0] : memref<8x128xf32, #tpu.memory_space<vmem>>, vector<8x128xf32>
    %c0_1 = arith.constant 0 : index
    %c0_2 = arith.constant 0 : index
    %1 = vector.load %arg2[%c0_1, %c0_2] : memref<8x1xf32, #tpu.memory_space<vmem>>, vector<8x1xf32>
    %2 = vector.broadcast %1 : vector<8x1xf32> to vector<8x128xf32>
    %3 = arith.subf %0, %2 : vector<8x128xf32>
    %c0_3 = arith.constant 0 : index
    %c0_4 = arith.constant 0 : index
    %4 = vector.load %arg3[%c0_3, %c0_4] : memref<8x8xf32, #tpu.memory_space<vmem>>, vector<8x8xf32>
    %c0_5 = arith.constant 0 : index
    %c0_6 = arith.constant 0 : index
    %5 = vector.load %arg5[%c0_5, %c0_6] : memref<8x8xf32, #tpu.memory_space<vmem>>, vector<8x8xf32>
    tpu.vector_store %arg5[%c0_5, %c0_6], %4 {strides = array<i32>} : memref<8x8xf32, #tpu.memory_space<vmem>>, vector<8x8xf32>,
    %c0_7 = arith.constant 0 : index
    %c0_8 = arith.constant 0 : index
    %6 = vector.load %arg6[%c0_7, %c0_8] : memref<8x128xf32, #tpu.memory_space<vmem>>, vector<8x128xf32>
    tpu.vector_store %arg6[%c0_7, %c0_8], %3 {strides = array<i32>} : memref<8x128xf32, #tpu.memory_space<vmem>>, vector<8x128xf32>,
    %7 = tpu.iota {dimensions = array<i32: 0>} : vector<8x1xi32>
    %cst = arith.constant 1.000000e+00 : f32
    %8 = vector.broadcast %cst : f32 to vector<1x1xf32>
    %c0_9 = arith.constant 0 : index
    %c0_10 = arith.constant 0 : index
    %9 = vector.load %arg5[%c0_9, %c0_10] : memref<8x8xf32, #tpu.memory_space<vmem>>, vector<8x8xf32>
    %c0_11 = arith.constant 0 : index
    %c0_12 = arith.constant 0 : index
    %10 = vector.load %arg6[%c0_11, %c0_12] : memref<8x128xf32, #tpu.memory_space<vmem>>, vector<8x128xf32>
    %11 = vector.extract_strided_slice %9 {offsets = [0, 0], sizes = [1, 8], strides = [1, 1]} : vector<8x8xf32> to vector<1x8xf32>
    %12 = vector.extract_strided_slice %10 {offsets = [0, 0], sizes = [1, 128], strides = [1, 1]} : vector<8x128xf32> to vector<1x128xf32>
    %13 = vector.extract_strided_slice %9 {offsets = [0, 0], sizes = [8, 1], strides = [1, 1]} : vector<8x8xf32> to vector<8x1xf32>
    %14 = vector.extract_strided_slice %11 {offsets = [0, 0], sizes = [1, 1], strides = [1, 1]} : vector<1x8xf32> to vector<1x1xf32>
    %15 = tpu.reciprocal %14 {approx = true} : vector<1x1xf32> -> vector<1x1xf32>
    %16 = arith.mulf %14, %15 : vector<1x1xf32>
    %cst_13 = arith.constant 2.000000e+00 : f32
    %17 = vector.broadcast %cst_13 : f32 to vector<1x1xf32>
    %18 = arith.subf %17, %16 : vector<1x1xf32>
    %19 = arith.mulf %15, %18 : vector<1x1xf32>
    %c0_i32 = arith.constant 0 : i32
    %20 = vector.broadcast %c0_i32 : i32 to vector<8x1xi32>
    %21 = arith.cmpi eq, %7, %20 : vector<8x1xi32>
    %22 = vector.broadcast %19 : vector<1x1xf32> to vector<8x1xf32>
    %23 = arith.mulf %13, %22 : vector<8x1xf32>
    %cst_14 = arith.constant 0.000000e+00 : f32
    %24 = vector.broadcast %cst_14 : f32 to vector<8x1xf32>
    %25 = arith.select %21, %24, %23 : vector<8x1xi1>, vector<8x1xf32>
    %26 = vector.broadcast %25 : vector<8x1xf32> to vector<8x8xf32>
    %27 = vector.broadcast %11 : vector<1x8xf32> to vector<8x8xf32>
    %28 = arith.mulf %26, %27 : vector<8x8xf32>
    %29 = arith.subf %9, %28 : vector<8x8xf32>
    %30 = vector.broadcast %25 : vector<8x1xf32> to vector<8x128xf32>
    %31 = vector.broadcast %12 : vector<1x128xf32> to vector<8x128xf32>
    %32 = arith.mulf %30, %31 : vector<8x128xf32>
    %33 = arith.subf %10, %32 : vector<8x128xf32>
    %34 = vector.broadcast %19 : vector<1x1xf32> to vector<8x8xf32>
    %35 = arith.mulf %29, %34 : vector<8x8xf32>
    %36 = vector.shape_cast %21 : vector<8x1xi1> to vector<8x1xi1>
    %37 = vector.broadcast %36 : vector<8x1xi1> to vector<8x8xi1>
    %38 = arith.select %37, %35, %29 : vector<8x8xi1>, vector<8x8xf32>
    %c0_15 = arith.constant 0 : index
    %c0_16 = arith.constant 0 : index
    %39 = vector.load %arg5[%c0_15, %c0_16] : memref<8x8xf32, #tpu.memory_space<vmem>>, vector<8x8xf32>
    tpu.vector_store %arg5[%c0_15, %c0_16], %38 {strides = array<i32>} : memref<8x8xf32, #tpu.memory_space<vmem>>, vector<8x8xf32>,
    %40 = vector.broadcast %19 : vector<1x1xf32> to vector<8x128xf32>
    %41 = arith.mulf %33, %40 : vector<8x128xf32>
    %42 = vector.shape_cast %21 : vector<8x1xi1> to vector<8x1xi1>
    %43 = vector.broadcast %42 : vector<8x1xi1> to vector<8x128xi1>
    %44 = arith.select %43, %41, %33 : vector<8x128xi1>, vector<8x128xf32>
    %c0_17 = arith.constant 0 : index
    %c0_18 = arith.constant 0 : index
    %45 = vector.load %arg6[%c0_17, %c0_18] : memref<8x128xf32, #tpu.memory_space<vmem>>, vector<8x128xf32>
    tpu.vector_store %arg6[%c0_17, %c0_18], %44 {strides = array<i32>} : memref<8x128xf32, #tpu.memory_space<vmem>>, vector<8x128xf32>,
    %46 = arith.mulf %8, %14 : vector<1x1xf32>
    %c0_19 = arith.constant 0 : index
    %c0_20 = arith.constant 0 : index
    %47 = vector.load %arg5[%c0_19, %c0_20] : memref<8x8xf32, #tpu.memory_space<vmem>>, vector<8x8xf32>
    %c0_21 = arith.constant 0 : index
    %c0_22 = arith.constant 0 : index
    %48 = vector.load %arg6[%c0_21, %c0_22] : memref<8x128xf32, #tpu.memory_space<vmem>>, vector<8x128xf32>
    %49 = vector.extract_strided_slice %47 {offsets = [1, 0], sizes = [1, 8], strides = [1, 1]} : vector<8x8xf32> to vector<1x8xf32>
    %50 = vector.extract_strided_slice %48 {offsets = [1, 0], sizes = [1, 128], strides = [1, 1]} : vector<8x128xf32> to vector<1x128xf32>
    %51 = vector.extract_strided_slice %47 {offsets = [0, 1], sizes = [8, 1], strides = [1, 1]} : vector<8x8xf32> to vector<8x1xf32>
    %52 = vector.extract_strided_slice %49 {offsets = [0, 1], sizes = [1, 1], strides = [1, 1]} : vector<1x8xf32> to vector<1x1xf32>
    %53 = tpu.reciprocal %52 {approx = true} : vector<1x1xf32> -> vector<1x1xf32>
    %54 = arith.mulf %52, %53 : vector<1x1xf32>
    %cst_23 = arith.constant 2.000000e+00 : f32
    %55 = vector.broadcast %cst_23 : f32 to vector<1x1xf32>
    %56 = arith.subf %55, %54 : vector<1x1xf32>
    %57 = arith.mulf %53, %56 : vector<1x1xf32>
    %c1_i32 = arith.constant 1 : i32
    %58 = vector.broadcast %c1_i32 : i32 to vector<8x1xi32>
    %59 = arith.cmpi eq, %7, %58 : vector<8x1xi32>
    %60 = vector.broadcast %57 : vector<1x1xf32> to vector<8x1xf32>
    %61 = arith.mulf %51, %60 : vector<8x1xf32>
    %cst_24 = arith.constant 0.000000e+00 : f32
    %62 = vector.broadcast %cst_24 : f32 to vector<8x1xf32>
    %63 = arith.select %59, %62, %61 : vector<8x1xi1>, vector<8x1xf32>
    %64 = vector.broadcast %63 : vector<8x1xf32> to vector<8x8xf32>
    %65 = vector.broadcast %49 : vector<1x8xf32> to vector<8x8xf32>
    %66 = arith.mulf %64, %65 : vector<8x8xf32>
    %67 = arith.subf %47, %66 : vector<8x8xf32>
    %68 = vector.broadcast %63 : vector<8x1xf32> to vector<8x128xf32>
    %69 = vector.broadcast %50 : vector<1x128xf32> to vector<8x128xf32>
    %70 = arith.mulf %68, %69 : vector<8x128xf32>
    %71 = arith.subf %48, %70 : vector<8x128xf32>
    %72 = vector.broadcast %57 : vector<1x1xf32> to vector<8x8xf32>
    %73 = arith.mulf %67, %72 : vector<8x8xf32>
    %74 = vector.shape_cast %59 : vector<8x1xi1> to vector<8x1xi1>
    %75 = vector.broadcast %74 : vector<8x1xi1> to vector<8x8xi1>
    %76 = arith.select %75, %73, %67 : vector<8x8xi1>, vector<8x8xf32>
    %c0_25 = arith.constant 0 : index
    %c0_26 = arith.constant 0 : index
    %77 = vector.load %arg5[%c0_25, %c0_26] : memref<8x8xf32, #tpu.memory_space<vmem>>, vector<8x8xf32>
    tpu.vector_store %arg5[%c0_25, %c0_26], %76 {strides = array<i32>} : memref<8x8xf32, #tpu.memory_space<vmem>>, vector<8x8xf32>,
    %78 = vector.broadcast %57 : vector<1x1xf32> to vector<8x128xf32>
    %79 = arith.mulf %71, %78 : vector<8x128xf32>
    %80 = vector.shape_cast %59 : vector<8x1xi1> to vector<8x1xi1>
    %81 = vector.broadcast %80 : vector<8x1xi1> to vector<8x128xi1>
    %82 = arith.select %81, %79, %71 : vector<8x128xi1>, vector<8x128xf32>
    %c0_27 = arith.constant 0 : index
    %c0_28 = arith.constant 0 : index
    %83 = vector.load %arg6[%c0_27, %c0_28] : memref<8x128xf32, #tpu.memory_space<vmem>>, vector<8x128xf32>
    tpu.vector_store %arg6[%c0_27, %c0_28], %82 {strides = array<i32>} : memref<8x128xf32, #tpu.memory_space<vmem>>, vector<8x128xf32>,
    %84 = arith.mulf %46, %52 : vector<1x1xf32>
    %c0_29 = arith.constant 0 : index
    %c0_30 = arith.constant 0 : index
    %85 = vector.load %arg5[%c0_29, %c0_30] : memref<8x8xf32, #tpu.memory_space<vmem>>, vector<8x8xf32>
    %c0_31 = arith.constant 0 : index
    %c0_32 = arith.constant 0 : index
    %86 = vector.load %arg6[%c0_31, %c0_32] : memref<8x128xf32, #tpu.memory_space<vmem>>, vector<8x128xf32>
    %87 = vector.extract_strided_slice %85 {offsets = [2, 0], sizes = [1, 8], strides = [1, 1]} : vector<8x8xf32> to vector<1x8xf32>
    %88 = vector.extract_strided_slice %86 {offsets = [2, 0], sizes = [1, 128], strides = [1, 1]} : vector<8x128xf32> to vector<1x128xf32>
    %89 = vector.extract_strided_slice %85 {offsets = [0, 2], sizes = [8, 1], strides = [1, 1]} : vector<8x8xf32> to vector<8x1xf32>
    %90 = vector.extract_strided_slice %87 {offsets = [0, 2], sizes = [1, 1], strides = [1, 1]} : vector<1x8xf32> to vector<1x1xf32>
    %91 = tpu.reciprocal %90 {approx = true} : vector<1x1xf32> -> vector<1x1xf32>
    %92 = arith.mulf %90, %91 : vector<1x1xf32>
    %cst_33 = arith.constant 2.000000e+00 : f32
    %93 = vector.broadcast %cst_33 : f32 to vector<1x1xf32>
    %94 = arith.subf %93, %92 : vector<1x1xf32>
    %95 = arith.mulf %91, %94 : vector<1x1xf32>
    %c2_i32 = arith.constant 2 : i32
    %96 = vector.broadcast %c2_i32 : i32 to vector<8x1xi32>
    %97 = arith.cmpi eq, %7, %96 : vector<8x1xi32>
    %98 = vector.broadcast %95 : vector<1x1xf32> to vector<8x1xf32>
    %99 = arith.mulf %89, %98 : vector<8x1xf32>
    %cst_34 = arith.constant 0.000000e+00 : f32
    %100 = vector.broadcast %cst_34 : f32 to vector<8x1xf32>
    %101 = arith.select %97, %100, %99 : vector<8x1xi1>, vector<8x1xf32>
    %102 = vector.broadcast %101 : vector<8x1xf32> to vector<8x8xf32>
    %103 = vector.broadcast %87 : vector<1x8xf32> to vector<8x8xf32>
    %104 = arith.mulf %102, %103 : vector<8x8xf32>
    %105 = arith.subf %85, %104 : vector<8x8xf32>
    %106 = vector.broadcast %101 : vector<8x1xf32> to vector<8x128xf32>
    %107 = vector.broadcast %88 : vector<1x128xf32> to vector<8x128xf32>
    %108 = arith.mulf %106, %107 : vector<8x128xf32>
    %109 = arith.subf %86, %108 : vector<8x128xf32>
    %110 = vector.broadcast %95 : vector<1x1xf32> to vector<8x8xf32>
    %111 = arith.mulf %105, %110 : vector<8x8xf32>
    %112 = vector.shape_cast %97 : vector<8x1xi1> to vector<8x1xi1>
    %113 = vector.broadcast %112 : vector<8x1xi1> to vector<8x8xi1>
    %114 = arith.select %113, %111, %105 : vector<8x8xi1>, vector<8x8xf32>
    %c0_35 = arith.constant 0 : index
    %c0_36 = arith.constant 0 : index
    %115 = vector.load %arg5[%c0_35, %c0_36] : memref<8x8xf32, #tpu.memory_space<vmem>>, vector<8x8xf32>
    tpu.vector_store %arg5[%c0_35, %c0_36], %114 {strides = array<i32>} : memref<8x8xf32, #tpu.memory_space<vmem>>, vector<8x8xf32>,
    %116 = vector.broadcast %95 : vector<1x1xf32> to vector<8x128xf32>
    %117 = arith.mulf %109, %116 : vector<8x128xf32>
    %118 = vector.shape_cast %97 : vector<8x1xi1> to vector<8x1xi1>
    %119 = vector.broadcast %118 : vector<8x1xi1> to vector<8x128xi1>
    %120 = arith.select %119, %117, %109 : vector<8x128xi1>, vector<8x128xf32>
    %c0_37 = arith.constant 0 : index
    %c0_38 = arith.constant 0 : index
    %121 = vector.load %arg6[%c0_37, %c0_38] : memref<8x128xf32, #tpu.memory_space<vmem>>, vector<8x128xf32>
    tpu.vector_store %arg6[%c0_37, %c0_38], %120 {strides = array<i32>} : memref<8x128xf32, #tpu.memory_space<vmem>>, vector<8x128xf32>,
    %122 = arith.mulf %84, %90 : vector<1x1xf32>
    %c0_39 = arith.constant 0 : index
    %c0_40 = arith.constant 0 : index
    %123 = vector.load %arg5[%c0_39, %c0_40] : memref<8x8xf32, #tpu.memory_space<vmem>>, vector<8x8xf32>
    %c0_41 = arith.constant 0 : index
    %c0_42 = arith.constant 0 : index
    %124 = vector.load %arg6[%c0_41, %c0_42] : memref<8x128xf32, #tpu.memory_space<vmem>>, vector<8x128xf32>
    %125 = vector.extract_strided_slice %123 {offsets = [3, 0], sizes = [1, 8], strides = [1, 1]} : vector<8x8xf32> to vector<1x8xf32>
    %126 = vector.extract_strided_slice %124 {offsets = [3, 0], sizes = [1, 128], strides = [1, 1]} : vector<8x128xf32> to vector<1x128xf32>
    %127 = vector.extract_strided_slice %123 {offsets = [0, 3], sizes = [8, 1], strides = [1, 1]} : vector<8x8xf32> to vector<8x1xf32>
    %128 = vector.extract_strided_slice %125 {offsets = [0, 3], sizes = [1, 1], strides = [1, 1]} : vector<1x8xf32> to vector<1x1xf32>
    %129 = tpu.reciprocal %128 {approx = true} : vector<1x1xf32> -> vector<1x1xf32>
    %130 = arith.mulf %128, %129 : vector<1x1xf32>
    %cst_43 = arith.constant 2.000000e+00 : f32
    %131 = vector.broadcast %cst_43 : f32 to vector<1x1xf32>
    %132 = arith.subf %131, %130 : vector<1x1xf32>
    %133 = arith.mulf %129, %132 : vector<1x1xf32>
    %c3_i32 = arith.constant 3 : i32
    %134 = vector.broadcast %c3_i32 : i32 to vector<8x1xi32>
    %135 = arith.cmpi eq, %7, %134 : vector<8x1xi32>
    %136 = vector.broadcast %133 : vector<1x1xf32> to vector<8x1xf32>
    %137 = arith.mulf %127, %136 : vector<8x1xf32>
    %cst_44 = arith.constant 0.000000e+00 : f32
    %138 = vector.broadcast %cst_44 : f32 to vector<8x1xf32>
    %139 = arith.select %135, %138, %137 : vector<8x1xi1>, vector<8x1xf32>
    %140 = vector.broadcast %139 : vector<8x1xf32> to vector<8x8xf32>
    %141 = vector.broadcast %125 : vector<1x8xf32> to vector<8x8xf32>
    %142 = arith.mulf %140, %141 : vector<8x8xf32>
    %143 = arith.subf %123, %142 : vector<8x8xf32>
    %144 = vector.broadcast %139 : vector<8x1xf32> to vector<8x128xf32>
    %145 = vector.broadcast %126 : vector<1x128xf32> to vector<8x128xf32>
    %146 = arith.mulf %144, %145 : vector<8x128xf32>
    %147 = arith.subf %124, %146 : vector<8x128xf32>
    %148 = vector.broadcast %133 : vector<1x1xf32> to vector<8x8xf32>
    %149 = arith.mulf %143, %148 : vector<8x8xf32>
    %150 = vector.shape_cast %135 : vector<8x1xi1> to vector<8x1xi1>
    %151 = vector.broadcast %150 : vector<8x1xi1> to vector<8x8xi1>
    %152 = arith.select %151, %149, %143 : vector<8x8xi1>, vector<8x8xf32>
    %c0_45 = arith.constant 0 : index
    %c0_46 = arith.constant 0 : index
    %153 = vector.load %arg5[%c0_45, %c0_46] : memref<8x8xf32, #tpu.memory_space<vmem>>, vector<8x8xf32>
    tpu.vector_store %arg5[%c0_45, %c0_46], %152 {strides = array<i32>} : memref<8x8xf32, #tpu.memory_space<vmem>>, vector<8x8xf32>,
    %154 = vector.broadcast %133 : vector<1x1xf32> to vector<8x128xf32>
    %155 = arith.mulf %147, %154 : vector<8x128xf32>
    %156 = vector.shape_cast %135 : vector<8x1xi1> to vector<8x1xi1>
    %157 = vector.broadcast %156 : vector<8x1xi1> to vector<8x128xi1>
    %158 = arith.select %157, %155, %147 : vector<8x128xi1>, vector<8x128xf32>
    %c0_47 = arith.constant 0 : index
    %c0_48 = arith.constant 0 : index
    %159 = vector.load %arg6[%c0_47, %c0_48] : memref<8x128xf32, #tpu.memory_space<vmem>>, vector<8x128xf32>
    tpu.vector_store %arg6[%c0_47, %c0_48], %158 {strides = array<i32>} : memref<8x128xf32, #tpu.memory_space<vmem>>, vector<8x128xf32>,
    %160 = arith.mulf %122, %128 : vector<1x1xf32>
    %c0_49 = arith.constant 0 : index
    %c0_50 = arith.constant 0 : index
    %161 = vector.load %arg5[%c0_49, %c0_50] : memref<8x8xf32, #tpu.memory_space<vmem>>, vector<8x8xf32>
    %c0_51 = arith.constant 0 : index
    %c0_52 = arith.constant 0 : index
    %162 = vector.load %arg6[%c0_51, %c0_52] : memref<8x128xf32, #tpu.memory_space<vmem>>, vector<8x128xf32>
    %163 = vector.extract_strided_slice %161 {offsets = [4, 0], sizes = [1, 8], strides = [1, 1]} : vector<8x8xf32> to vector<1x8xf32>
    %164 = vector.extract_strided_slice %162 {offsets = [4, 0], sizes = [1, 128], strides = [1, 1]} : vector<8x128xf32> to vector<1x128xf32>
    %165 = vector.extract_strided_slice %161 {offsets = [0, 4], sizes = [8, 1], strides = [1, 1]} : vector<8x8xf32> to vector<8x1xf32>
    %166 = vector.extract_strided_slice %163 {offsets = [0, 4], sizes = [1, 1], strides = [1, 1]} : vector<1x8xf32> to vector<1x1xf32>
    %167 = tpu.reciprocal %166 {approx = true} : vector<1x1xf32> -> vector<1x1xf32>
    %168 = arith.mulf %166, %167 : vector<1x1xf32>
    %cst_53 = arith.constant 2.000000e+00 : f32
    %169 = vector.broadcast %cst_53 : f32 to vector<1x1xf32>
    %170 = arith.subf %169, %168 : vector<1x1xf32>
    %171 = arith.mulf %167, %170 : vector<1x1xf32>
    %c4_i32 = arith.constant 4 : i32
    %172 = vector.broadcast %c4_i32 : i32 to vector<8x1xi32>
    %173 = arith.cmpi eq, %7, %172 : vector<8x1xi32>
    %174 = vector.broadcast %171 : vector<1x1xf32> to vector<8x1xf32>
    %175 = arith.mulf %165, %174 : vector<8x1xf32>
    %cst_54 = arith.constant 0.000000e+00 : f32
    %176 = vector.broadcast %cst_54 : f32 to vector<8x1xf32>
    %177 = arith.select %173, %176, %175 : vector<8x1xi1>, vector<8x1xf32>
    %178 = vector.broadcast %177 : vector<8x1xf32> to vector<8x8xf32>
    %179 = vector.broadcast %163 : vector<1x8xf32> to vector<8x8xf32>
    %180 = arith.mulf %178, %179 : vector<8x8xf32>
    %181 = arith.subf %161, %180 : vector<8x8xf32>
    %182 = vector.broadcast %177 : vector<8x1xf32> to vector<8x128xf32>
    %183 = vector.broadcast %164 : vector<1x128xf32> to vector<8x128xf32>
    %184 = arith.mulf %182, %183 : vector<8x128xf32>
    %185 = arith.subf %162, %184 : vector<8x128xf32>
    %186 = vector.broadcast %171 : vector<1x1xf32> to vector<8x8xf32>
    %187 = arith.mulf %181, %186 : vector<8x8xf32>
    %188 = vector.shape_cast %173 : vector<8x1xi1> to vector<8x1xi1>
    %189 = vector.broadcast %188 : vector<8x1xi1> to vector<8x8xi1>
    %190 = arith.select %189, %187, %181 : vector<8x8xi1>, vector<8x8xf32>
    %c0_55 = arith.constant 0 : index
    %c0_56 = arith.constant 0 : index
    %191 = vector.load %arg5[%c0_55, %c0_56] : memref<8x8xf32, #tpu.memory_space<vmem>>, vector<8x8xf32>
    tpu.vector_store %arg5[%c0_55, %c0_56], %190 {strides = array<i32>} : memref<8x8xf32, #tpu.memory_space<vmem>>, vector<8x8xf32>,
    %192 = vector.broadcast %171 : vector<1x1xf32> to vector<8x128xf32>
    %193 = arith.mulf %185, %192 : vector<8x128xf32>
    %194 = vector.shape_cast %173 : vector<8x1xi1> to vector<8x1xi1>
    %195 = vector.broadcast %194 : vector<8x1xi1> to vector<8x128xi1>
    %196 = arith.select %195, %193, %185 : vector<8x128xi1>, vector<8x128xf32>
    %c0_57 = arith.constant 0 : index
    %c0_58 = arith.constant 0 : index
    %197 = vector.load %arg6[%c0_57, %c0_58] : memref<8x128xf32, #tpu.memory_space<vmem>>, vector<8x128xf32>
    tpu.vector_store %arg6[%c0_57, %c0_58], %196 {strides = array<i32>} : memref<8x128xf32, #tpu.memory_space<vmem>>, vector<8x128xf32>,
    %198 = arith.mulf %160, %166 : vector<1x1xf32>
    %c0_59 = arith.constant 0 : index
    %c0_60 = arith.constant 0 : index
    %199 = vector.load %arg5[%c0_59, %c0_60] : memref<8x8xf32, #tpu.memory_space<vmem>>, vector<8x8xf32>
    %c0_61 = arith.constant 0 : index
    %c0_62 = arith.constant 0 : index
    %200 = vector.load %arg6[%c0_61, %c0_62] : memref<8x128xf32, #tpu.memory_space<vmem>>, vector<8x128xf32>
    %201 = vector.extract_strided_slice %199 {offsets = [5, 0], sizes = [1, 8], strides = [1, 1]} : vector<8x8xf32> to vector<1x8xf32>
    %202 = vector.extract_strided_slice %200 {offsets = [5, 0], sizes = [1, 128], strides = [1, 1]} : vector<8x128xf32> to vector<1x128xf32>
    %203 = vector.extract_strided_slice %199 {offsets = [0, 5], sizes = [8, 1], strides = [1, 1]} : vector<8x8xf32> to vector<8x1xf32>
    %204 = vector.extract_strided_slice %201 {offsets = [0, 5], sizes = [1, 1], strides = [1, 1]} : vector<1x8xf32> to vector<1x1xf32>
    %205 = tpu.reciprocal %204 {approx = true} : vector<1x1xf32> -> vector<1x1xf32>
    %206 = arith.mulf %204, %205 : vector<1x1xf32>
    %cst_63 = arith.constant 2.000000e+00 : f32
    %207 = vector.broadcast %cst_63 : f32 to vector<1x1xf32>
    %208 = arith.subf %207, %206 : vector<1x1xf32>
    %209 = arith.mulf %205, %208 : vector<1x1xf32>
    %c5_i32 = arith.constant 5 : i32
    %210 = vector.broadcast %c5_i32 : i32 to vector<8x1xi32>
    %211 = arith.cmpi eq, %7, %210 : vector<8x1xi32>
    %212 = vector.broadcast %209 : vector<1x1xf32> to vector<8x1xf32>
    %213 = arith.mulf %203, %212 : vector<8x1xf32>
    %cst_64 = arith.constant 0.000000e+00 : f32
    %214 = vector.broadcast %cst_64 : f32 to vector<8x1xf32>
    %215 = arith.select %211, %214, %213 : vector<8x1xi1>, vector<8x1xf32>
    %216 = vector.broadcast %215 : vector<8x1xf32> to vector<8x8xf32>
    %217 = vector.broadcast %201 : vector<1x8xf32> to vector<8x8xf32>
    %218 = arith.mulf %216, %217 : vector<8x8xf32>
    %219 = arith.subf %199, %218 : vector<8x8xf32>
    %220 = vector.broadcast %215 : vector<8x1xf32> to vector<8x128xf32>
    %221 = vector.broadcast %202 : vector<1x128xf32> to vector<8x128xf32>
    %222 = arith.mulf %220, %221 : vector<8x128xf32>
    %223 = arith.subf %200, %222 : vector<8x128xf32>
    %224 = vector.broadcast %209 : vector<1x1xf32> to vector<8x8xf32>
    %225 = arith.mulf %219, %224 : vector<8x8xf32>
    %226 = vector.shape_cast %211 : vector<8x1xi1> to vector<8x1xi1>
    %227 = vector.broadcast %226 : vector<8x1xi1> to vector<8x8xi1>
    %228 = arith.select %227, %225, %219 : vector<8x8xi1>, vector<8x8xf32>
    %c0_65 = arith.constant 0 : index
    %c0_66 = arith.constant 0 : index
    %229 = vector.load %arg5[%c0_65, %c0_66] : memref<8x8xf32, #tpu.memory_space<vmem>>, vector<8x8xf32>
    tpu.vector_store %arg5[%c0_65, %c0_66], %228 {strides = array<i32>} : memref<8x8xf32, #tpu.memory_space<vmem>>, vector<8x8xf32>,
    %230 = vector.broadcast %209 : vector<1x1xf32> to vector<8x128xf32>
    %231 = arith.mulf %223, %230 : vector<8x128xf32>
    %232 = vector.shape_cast %211 : vector<8x1xi1> to vector<8x1xi1>
    %233 = vector.broadcast %232 : vector<8x1xi1> to vector<8x128xi1>
    %234 = arith.select %233, %231, %223 : vector<8x128xi1>, vector<8x128xf32>
    %c0_67 = arith.constant 0 : index
    %c0_68 = arith.constant 0 : index
    %235 = vector.load %arg6[%c0_67, %c0_68] : memref<8x128xf32, #tpu.memory_space<vmem>>, vector<8x128xf32>
    tpu.vector_store %arg6[%c0_67, %c0_68], %234 {strides = array<i32>} : memref<8x128xf32, #tpu.memory_space<vmem>>, vector<8x128xf32>,
    %236 = arith.mulf %198, %204 : vector<1x1xf32>
    %c0_69 = arith.constant 0 : index
    %c0_70 = arith.constant 0 : index
    %237 = vector.load %arg5[%c0_69, %c0_70] : memref<8x8xf32, #tpu.memory_space<vmem>>, vector<8x8xf32>
    %c0_71 = arith.constant 0 : index
    %c0_72 = arith.constant 0 : index
    %238 = vector.load %arg6[%c0_71, %c0_72] : memref<8x128xf32, #tpu.memory_space<vmem>>, vector<8x128xf32>
    %239 = vector.extract_strided_slice %237 {offsets = [6, 0], sizes = [1, 8], strides = [1, 1]} : vector<8x8xf32> to vector<1x8xf32>
    %240 = vector.extract_strided_slice %238 {offsets = [6, 0], sizes = [1, 128], strides = [1, 1]} : vector<8x128xf32> to vector<1x128xf32>
    %241 = vector.extract_strided_slice %237 {offsets = [0, 6], sizes = [8, 1], strides = [1, 1]} : vector<8x8xf32> to vector<8x1xf32>
    %242 = vector.extract_strided_slice %239 {offsets = [0, 6], sizes = [1, 1], strides = [1, 1]} : vector<1x8xf32> to vector<1x1xf32>
    %243 = tpu.reciprocal %242 {approx = true} : vector<1x1xf32> -> vector<1x1xf32>
    %244 = arith.mulf %242, %243 : vector<1x1xf32>
    %cst_73 = arith.constant 2.000000e+00 : f32
    %245 = vector.broadcast %cst_73 : f32 to vector<1x1xf32>
    %246 = arith.subf %245, %244 : vector<1x1xf32>
    %247 = arith.mulf %243, %246 : vector<1x1xf32>
    %c6_i32 = arith.constant 6 : i32
    %248 = vector.broadcast %c6_i32 : i32 to vector<8x1xi32>
    %249 = arith.cmpi eq, %7, %248 : vector<8x1xi32>
    %250 = vector.broadcast %247 : vector<1x1xf32> to vector<8x1xf32>
    %251 = arith.mulf %241, %250 : vector<8x1xf32>
    %cst_74 = arith.constant 0.000000e+00 : f32
    %252 = vector.broadcast %cst_74 : f32 to vector<8x1xf32>
    %253 = arith.select %249, %252, %251 : vector<8x1xi1>, vector<8x1xf32>
    %254 = vector.broadcast %253 : vector<8x1xf32> to vector<8x8xf32>
    %255 = vector.broadcast %239 : vector<1x8xf32> to vector<8x8xf32>
    %256 = arith.mulf %254, %255 : vector<8x8xf32>
    %257 = arith.subf %237, %256 : vector<8x8xf32>
    %258 = vector.broadcast %253 : vector<8x1xf32> to vector<8x128xf32>
    %259 = vector.broadcast %240 : vector<1x128xf32> to vector<8x128xf32>
    %260 = arith.mulf %258, %259 : vector<8x128xf32>
    %261 = arith.subf %238, %260 : vector<8x128xf32>
    %262 = vector.broadcast %247 : vector<1x1xf32> to vector<8x8xf32>
    %263 = arith.mulf %257, %262 : vector<8x8xf32>
    %264 = vector.shape_cast %249 : vector<8x1xi1> to vector<8x1xi1>
    %265 = vector.broadcast %264 : vector<8x1xi1> to vector<8x8xi1>
    %266 = arith.select %265, %263, %257 : vector<8x8xi1>, vector<8x8xf32>
    %c0_75 = arith.constant 0 : index
    %c0_76 = arith.constant 0 : index
    %267 = vector.load %arg5[%c0_75, %c0_76] : memref<8x8xf32, #tpu.memory_space<vmem>>, vector<8x8xf32>
    tpu.vector_store %arg5[%c0_75, %c0_76], %266 {strides = array<i32>} : memref<8x8xf32, #tpu.memory_space<vmem>>, vector<8x8xf32>,
    %268 = vector.broadcast %247 : vector<1x1xf32> to vector<8x128xf32>
    %269 = arith.mulf %261, %268 : vector<8x128xf32>
    %270 = vector.shape_cast %249 : vector<8x1xi1> to vector<8x1xi1>
    %271 = vector.broadcast %270 : vector<8x1xi1> to vector<8x128xi1>
    %272 = arith.select %271, %269, %261 : vector<8x128xi1>, vector<8x128xf32>
    %c0_77 = arith.constant 0 : index
    %c0_78 = arith.constant 0 : index
    %273 = vector.load %arg6[%c0_77, %c0_78] : memref<8x128xf32, #tpu.memory_space<vmem>>, vector<8x128xf32>
    tpu.vector_store %arg6[%c0_77, %c0_78], %272 {strides = array<i32>} : memref<8x128xf32, #tpu.memory_space<vmem>>, vector<8x128xf32>,
    %274 = arith.mulf %236, %242 : vector<1x1xf32>
    %c0_79 = arith.constant 0 : index
    %c0_80 = arith.constant 0 : index
    %275 = vector.load %arg5[%c0_79, %c0_80] : memref<8x8xf32, #tpu.memory_space<vmem>>, vector<8x8xf32>
    %c0_81 = arith.constant 0 : index
    %c0_82 = arith.constant 0 : index
    %276 = vector.load %arg6[%c0_81, %c0_82] : memref<8x128xf32, #tpu.memory_space<vmem>>, vector<8x128xf32>
    %277 = vector.extract_strided_slice %275 {offsets = [7, 0], sizes = [1, 8], strides = [1, 1]} : vector<8x8xf32> to vector<1x8xf32>
    %278 = vector.extract_strided_slice %276 {offsets = [7, 0], sizes = [1, 128], strides = [1, 1]} : vector<8x128xf32> to vector<1x128xf32>
    %279 = vector.extract_strided_slice %275 {offsets = [0, 7], sizes = [8, 1], strides = [1, 1]} : vector<8x8xf32> to vector<8x1xf32>
    %280 = vector.extract_strided_slice %277 {offsets = [0, 7], sizes = [1, 1], strides = [1, 1]} : vector<1x8xf32> to vector<1x1xf32>
    %281 = tpu.reciprocal %280 {approx = true} : vector<1x1xf32> -> vector<1x1xf32>
    %282 = arith.mulf %280, %281 : vector<1x1xf32>
    %cst_83 = arith.constant 2.000000e+00 : f32
    %283 = vector.broadcast %cst_83 : f32 to vector<1x1xf32>
    %284 = arith.subf %283, %282 : vector<1x1xf32>
    %285 = arith.mulf %281, %284 : vector<1x1xf32>
    %c7_i32 = arith.constant 7 : i32
    %286 = vector.broadcast %c7_i32 : i32 to vector<8x1xi32>
    %287 = arith.cmpi eq, %7, %286 : vector<8x1xi32>
    %288 = vector.broadcast %285 : vector<1x1xf32> to vector<8x1xf32>
    %289 = arith.mulf %279, %288 : vector<8x1xf32>
    %cst_84 = arith.constant 0.000000e+00 : f32
    %290 = vector.broadcast %cst_84 : f32 to vector<8x1xf32>
    %291 = arith.select %287, %290, %289 : vector<8x1xi1>, vector<8x1xf32>
    %292 = vector.broadcast %291 : vector<8x1xf32> to vector<8x8xf32>
    %293 = vector.broadcast %277 : vector<1x8xf32> to vector<8x8xf32>
    %294 = arith.mulf %292, %293 : vector<8x8xf32>
    %295 = arith.subf %275, %294 : vector<8x8xf32>
    %296 = vector.broadcast %291 : vector<8x1xf32> to vector<8x128xf32>
    %297 = vector.broadcast %278 : vector<1x128xf32> to vector<8x128xf32>
    %298 = arith.mulf %296, %297 : vector<8x128xf32>
    %299 = arith.subf %276, %298 : vector<8x128xf32>
    %300 = vector.broadcast %285 : vector<1x1xf32> to vector<8x8xf32>
    %301 = arith.mulf %295, %300 : vector<8x8xf32>
    %302 = vector.shape_cast %287 : vector<8x1xi1> to vector<8x1xi1>
    %303 = vector.broadcast %302 : vector<8x1xi1> to vector<8x8xi1>
    %304 = arith.select %303, %301, %295 : vector<8x8xi1>, vector<8x8xf32>
    %c0_85 = arith.constant 0 : index
    %c0_86 = arith.constant 0 : index
    %305 = vector.load %arg5[%c0_85, %c0_86] : memref<8x8xf32, #tpu.memory_space<vmem>>, vector<8x8xf32>
    tpu.vector_store %arg5[%c0_85, %c0_86], %304 {strides = array<i32>} : memref<8x8xf32, #tpu.memory_space<vmem>>, vector<8x8xf32>,
    %306 = vector.broadcast %285 : vector<1x1xf32> to vector<8x128xf32>
    %307 = arith.mulf %299, %306 : vector<8x128xf32>
    %308 = vector.shape_cast %287 : vector<8x1xi1> to vector<8x1xi1>
    %309 = vector.broadcast %308 : vector<8x1xi1> to vector<8x128xi1>
    %310 = arith.select %309, %307, %299 : vector<8x128xi1>, vector<8x128xf32>
    %c0_87 = arith.constant 0 : index
    %c0_88 = arith.constant 0 : index
    %311 = vector.load %arg6[%c0_87, %c0_88] : memref<8x128xf32, #tpu.memory_space<vmem>>, vector<8x128xf32>
    tpu.vector_store %arg6[%c0_87, %c0_88], %310 {strides = array<i32>} : memref<8x128xf32, #tpu.memory_space<vmem>>, vector<8x128xf32>,
    %312 = arith.mulf %274, %280 : vector<1x1xf32>
    %c0_89 = arith.constant 0 : index
    %c0_90 = arith.constant 0 : index
    %313 = vector.load %arg6[%c0_89, %c0_90] : memref<8x128xf32, #tpu.memory_space<vmem>>, vector<8x128xf32>
    %314 = arith.mulf %313, %3 : vector<8x128xf32>
    %cst_91 = arith.constant dense<0.000000e+00> : vector<128xf32>
    %315 = vector.multi_reduction <add>, %314, %cst_91 [0] : vector<8x128xf32> to vector<128xf32>
    %316 = vector.shape_cast %315 : vector<128xf32> to vector<1x128xf32>
    %317 = math.log %312 : vector<1x1xf32>
    %cst_92 = arith.constant -5.000000e-01 : f32
    %318 = vector.broadcast %cst_92 : f32 to vector<1x128xf32>
    %319 = arith.mulf %318, %316 : vector<1x128xf32>
    %cst_93 = arith.constant 14.7030163 : f32
    %320 = vector.broadcast %cst_93 : f32 to vector<1x1xf32>
    %321 = arith.addf %320, %317 : vector<1x1xf32>
    %cst_94 = arith.constant 5.000000e-01 : f32
    %322 = vector.broadcast %cst_94 : f32 to vector<1x1xf32>
    %323 = arith.mulf %322, %321 : vector<1x1xf32>
    %324 = vector.broadcast %323 : vector<1x1xf32> to vector<1x128xf32>
    %325 = arith.subf %319, %324 : vector<1x128xf32>
    %326 = math.exp %325 : vector<1x128xf32>
    %c0_95 = arith.constant 0 : index
    %c0_96 = arith.constant 0 : index
    %327 = vector.load %arg4[%c0_95, %c0_96] : memref<1x128xf32, #tpu.memory_space<vmem>>, vector<1x128xf32>
    tpu.vector_store %arg4[%c0_95, %c0_96], %326 {strides = array<i32>} : memref<1x128xf32, #tpu.memory_space<vmem>>, vector<1x128xf32>,
    return
  }
  func.func @transform_0(%arg0: i32) -> (i32, i32) {
    %c0_i32 = arith.constant 0 : i32
    %c0_i32_0 = arith.constant 0 : i32
    return %c0_i32, %arg0 : i32, i32
  }
  func.func @transform_1(%arg0: i32) -> (i32, i32) {
    %c0_i32 = arith.constant 0 : i32
    %c0_i32_0 = arith.constant 0 : i32
    %c0_i32_1 = arith.constant 0 : i32
    return %c0_i32, %c0_i32_0 : i32, i32
  }
  func.func @transform_2(%arg0: i32) -> (i32, i32) {
    %c0_i32 = arith.constant 0 : i32
    %c0_i32_0 = arith.constant 0 : i32
    %c0_i32_1 = arith.constant 0 : i32
    return %c0_i32, %c0_i32_0 : i32, i32
  }
  func.func @transform_3(%arg0: i32) -> (i32, i32) {
    %c0_i32 = arith.constant 0 : i32
    %c0_i32_0 = arith.constant 0 : i32
    return %c0_i32, %arg0 : i32, i32
  }
}

</mosaic_0001>

<bundles_post_ra>
// kernel: tpu_custom_call.1
= control target key start
LH: loop header
LB: loop body
LE: loop exit
PB: predicated region body
PF: predicated region fallthrough
CT: control target
= control target key end

     0   :  { %vm24_vm0 = vcmask 64512   ;;  %s846_s0 = inlined_call_operand.vmem [shape: f32[8,128], index: 0, kind: input, shape index: {}]   ;;  %s847_s1 = inlined_call_operand.vmem [shape: f32[8,1], index: 1, kind: input, shape index: {}]   ;;  %s848_s2 = inlined_call_operand.vmem [shape: f32[8,8], index: 2, kind: input, shape index: {}]   ;;  %s849_s3 = inlined_call_operand.hbm [shape: f32[1,128], index: 3, kind: output, shape index: {}]  }
   0x1   :  { %v23_v0 = vld [vmem:[%s848_s2] sm:$0xff] }
   0x2   :  { %8 = vsyncpa [#allocation5], 0  ;;  %v551_v1 = vmov 0   ;;  %25 = vst.msk [vmem:[#allocation2] sm:$0xff] %vm24_vm0, %v23_v0  ;;  %v27_v3 = vlaneseq  ;;  %v552_v13 = vmov 1   ;;  %s553_s14 = smov 127  }
   0x3   :  { %496 = vset.pattern.permute.xlu0 %v551_v1  ;;  %497 = vset.pattern.permute.xlu1 %v552_v13  ;;  %v554_v31 = vmov 2   ;;  %s555_s16 = smov 126   ;;  %v556_v50 = vmov 3   ;;  %s557_s18 = smov 125  }
   0x4   :  { %v595_v4 = vshrl.u32 %v27_v3, 7  ;;  %s559_s20 = smov 124   ;;  %s561_s22 = smov 123  }
   0x5   :  { %s563_s24 = smov 122   ;;  %s565_s28 = smov 121  }
   0x6   :  { %v599_v8 = vsub.s32 0, %v595_v4  ;;  %vm35_vm1 = vcmp.eq.s32.totalorder %v595_v4, 0  ;;  %v625_v26 = vsub.s32 1, %v595_v4  ;;  %vm77_vm2 = vcmp.eq.s32.totalorder %v595_v4, 1  ;;  %s566_s30 = smov [#allocation4]  }
   0x7   :  { %v652_v45 = vsub.s32 2, %v595_v4  ;;  %vm128_vm3 = vcmp.eq.s32.totalorder %v595_v4, 2  ;;  %v680_v0 = vsub.s32 3, %v595_v4  ;;  %vm179_vm4 = vcmp.eq.s32.totalorder %v595_v4, 3  ;;  %s456_s4 = sshll.u32 %s566_s30, 4  ;;  %s457_s4 = int_to_ptr.vmem [resolvable:$true] %s456_s4 }
   0x8   :  { %vm230_vm5 = vcmp.eq.s32.totalorder %v595_v4, 4  ;;  %vm281_vm6 = vcmp.eq.s32.totalorder %v595_v4, 5  ;;  %vm332_vm7 = vcmp.eq.s32.totalorder %v595_v4, 6  ;;  %vm383_vm8 = vcmp.eq.s32.totalorder %v595_v4, 7  ;;  %s527_s5 = scalar_lea.vmem %s457_s4, 16  ;;  %s531_s6 = scalar_lea.vmem %s457_s4, 32 }
   0x9   :  { %v592_v2 = vld [vmem:[#allocation2] sm:$0xff]  ;;  %p528_p0 = scmp.ne.s32.totalorder %s457_s4, %s527_s5  ;;  %p532_p1 = scmp.lt.s32.totalorder %s457_s4, %s457_s4 }
   0xa   :  { %507 = vrcp.f32 %v592_v2  ;;  %v50_v14 = vrot.slane %v592_v2, %v599_v8  ;;  %p533_p2 = scmp.lt.s32.totalorder %s531_s6, %s527_s5 }
   0xc   :  { %p534_p3 = por %p533_p2, %p532_p1 }
   0xe   :  { %p535_p4 = pnand %p534_p3, %p528_p0 }
  0x14   :  { %v508_v5 = vpop.eup %507 }
  0x15   :  { %v32_v6 = vmul.f32 %v508_v5, %v592_v2 }
  0x17   :  { %v33_v7 = vsub.f32 2.0, %v32_v6 }
  0x19   :  { %v34_v9 = vmul.f32 %v508_v5, %v33_v7 }
  0x1b   :  { %v39_v10 = vrot.slane %v34_v9, %v599_v8  ;;  %464 = vpush %v34_v9  ;;  %v558_v9 = vmov 4  }
  0x1d   :  { %v40_v11 = vmul.f32 %v39_v10, %v592_v2 }
  0x1f   :  { %v41_v12 = vsel %vm35_vm1, 0.0, %v40_v11 }
  0x20   :  { %44 = vperm.xlu0 %496, %v41_v12  }
  0x24   :  { %498 = vset.pattern.permute.xlu0 %v554_v31 }
  0x4c   :  { %s608_s2 = spop %464 }
  0x4d   :  { %v61_v17 = vstv %s608_s2 }
  0x9f   :  { %v610_v15 = vpop.permute.xlu0 %44 }
  0xa0   :  { %v51_v16 = vmul.f32 %v50_v14, %v610_v15 }
  0xa2   :  { %v52_v18 = vsub.f32 %v592_v2, %v51_v16 }
  0xa4   :  { %v63_v19 = vmul.f32 %v61_v17, %v52_v18 }
  0xa6   :  { %v66_v20 = vsel %vm35_vm1, %v63_v19, %v52_v18 }
  0xa7   :  { %67 = vst.msk [vmem:[#allocation2] sm:$0xff] %vm24_vm0, %v66_v20 }
  0xae   :  { %v620_v21 = vld [vmem:[#allocation2] sm:$0xff] }
  0xaf   :  { %509 = vrcp.f32 %v620_v21  ;;  %v92_v34 = vrot.slane %v620_v21, %v625_v26 }
  0xb9   :  { %v510_v22 = vpop.eup %509 }
  0xba   :  { %v74_v23 = vmul.f32 %v510_v22, %v620_v21 }
  0xbc   :  { %v75_v24 = vsub.f32 2.0, %v74_v23 }
  0xbe   :  { %v76_v25 = vmul.f32 %v510_v22, %v75_v24 }
  0xc0   :  { %v102_v27 = vrot.slane %v76_v25, 1  ;;  %v81_v28 = vrot.slane %v76_v25, %v625_v26 }
  0xc2   :  { %103 = vrot.lane.b32.xlu0 %v102_v27, %s553_s14  ;;  %v82_v29 = vmul.f32 %v81_v28, %v620_v21  ;;  %v707_v27 = vsub.s32 4, %v595_v4 }
  0xc4   :  { %v83_v30 = vsel %vm77_vm2, 0.0, %v82_v29 }
  0xc5   :  { %86 = vperm.xlu1 %497, %v83_v30  }
  0xc9   :  { %499 = vset.pattern.permute.xlu1 %v556_v50  ;;  %v730_v50 = vsub.s32 5, %v595_v4 }
 0x134   :  { %v104_v32 = vpop.permute.xlu0 %103 }
 0x135   :  { %466 = vpush %v104_v32  ;;  %v560_v32 = vmov 5  }
 0x144   :  { %v633_v33 = vpop.permute.xlu1 %86 }
 0x145   :  { %v93_v35 = vmul.f32 %v92_v34, %v633_v33 }
 0x147   :  { %v94_v36 = vsub.f32 %v620_v21, %v93_v35 }
 0x166   :  { %s639_s15 = spop %466 }
 0x167   :  { %v106_v37 = vstv %s639_s15 }
 0x168   :  { %v108_v38 = vmul.f32 %v106_v37, %v94_v36 }
 0x16a   :  { %v111_v39 = vsel %vm77_vm2, %v108_v38, %v94_v36 }
 0x16b   :  { %112 = vst.msk [vmem:[#allocation2] sm:$0xff] %vm24_vm0, %v111_v39 }
 0x172   :  { %v647_v40 = vld [vmem:[#allocation2] sm:$0xff] }
 0x173   :  { %511 = vrcp.f32 %v647_v40  ;;  %v143_v53 = vrot.slane %v647_v40, %v652_v45 }
 0x17d   :  { %v512_v41 = vpop.eup %511 }
 0x17e   :  { %v125_v42 = vmul.f32 %v512_v41, %v647_v40 }
 0x180   :  { %v126_v43 = vsub.f32 2.0, %v125_v42 }
 0x182   :  { %v127_v44 = vmul.f32 %v512_v41, %v126_v43 }
 0x184   :  { %v153_v46 = vrot.slane %v127_v44, 2  ;;  %v132_v47 = vrot.slane %v127_v44, %v652_v45 }
 0x186   :  { %154 = vrot.lane.b32.xlu1 %v153_v46, %s555_s16  ;;  %v133_v48 = vmul.f32 %v132_v47, %v647_v40 }
 0x188   :  { %v134_v49 = vsel %vm128_vm3, 0.0, %v133_v48 }
 0x189   :  { %137 = vperm.xlu0 %498, %v134_v49  }
 0x18d   :  { %503 = vset.pattern.permute.xlu0 %v551_v1 }
 0x1f8   :  { %v155_v51 = vpop.permute.xlu1 %154 }
 0x1f9   :  { %468 = vpush %v155_v51 }
 0x208   :  { %v661_v52 = vpop.permute.xlu0 %137 }
 0x209   :  { %v144_v54 = vmul.f32 %v143_v53, %v661_v52 }
 0x20b   :  { %v145_v55 = vsub.f32 %v647_v40, %v144_v54 }
 0x22a   :  { %s667_s17 = spop %468 }
 0x22b   :  { %v157_v56 = vstv %s667_s17 }
 0x22c   :  { %v159_v57 = vmul.f32 %v157_v56, %v145_v55 }
 0x22e   :  { %v162_v58 = vsel %vm128_vm3, %v159_v57, %v145_v55  ;;  %v562_v57 = vmov 6  }
 0x22f   :  { %163 = vst.msk [vmem:[#allocation2] sm:$0xff] %vm24_vm0, %v162_v58 }
 0x236   :  { %v675_v59 = vld [vmem:[#allocation2] sm:$0xff] }
 0x237   :  { %513 = vrcp.f32 %v675_v59  ;;  %v194_v12 = vrot.slane %v675_v59, %v680_v0 }
 0x241   :  { %v514_v60 = vpop.eup %513 }
 0x242   :  { %v176_v61 = vmul.f32 %v514_v60, %v675_v59 }
 0x244   :  { %v177_v62 = vsub.f32 2.0, %v176_v61 }
 0x246   :  { %v178_v63 = vmul.f32 %v514_v60, %v177_v62 }
 0x248   :  { %v204_v3 = vrot.slane %v178_v63, 3  ;;  %v183_v5 = vrot.slane %v178_v63, %v680_v0 }
 0x24a   :  { %205 = vrot.lane.b32.xlu1 %v204_v3, %s557_s18  ;;  %v184_v6 = vmul.f32 %v183_v5, %v675_v59 }
 0x24c   :  { %v185_v7 = vsel %vm179_vm4, 0.0, %v184_v6 }
 0x24e   :  { %188 = vperm.xlu1 %499, %v185_v7  }
 0x252   :  { %500 = vset.pattern.permute.xlu1 %v558_v9 }
 0x2bc   :  { %v206_v10 = vpop.permute.xlu1 %205 }
 0x2bd   :  { %470 = vpush %v206_v10 }
 0x2cd   :  { %v688_v11 = vpop.permute.xlu1 %188 }
 0x2ce   :  { %v195_v13 = vmul.f32 %v194_v12, %v688_v11 }
 0x2d0   :  { %v196_v14 = vsub.f32 %v675_v59, %v195_v13 }
 0x2ee   :  { %s694_s19 = spop %470 }
 0x2ef   :  { %v208_v16 = vstv %s694_s19 }
 0x2f0   :  { %v210_v18 = vmul.f32 %v208_v16, %v196_v14 }
 0x2f2   :  { %v213_v19 = vsel %vm179_vm4, %v210_v18, %v196_v14  ;;  %v750_v14 = vsub.s32 6, %v595_v4 }
 0x2f3   :  { %214 = vst.msk [vmem:[#allocation2] sm:$0xff] %vm24_vm0, %v213_v19 }
 0x2fa   :  { %v702_v20 = vld [vmem:[#allocation2] sm:$0xff] }
 0x2fb   :  { %515 = vrcp.f32 %v702_v20  ;;  %v245_v36 = vrot.slane %v702_v20, %v707_v27 }
 0x305   :  { %v516_v22 = vpop.eup %515 }
 0x306   :  { %v227_v23 = vmul.f32 %v516_v22, %v702_v20 }
 0x308   :  { %v228_v24 = vsub.f32 2.0, %v227_v23  ;;  %v16_v23 = vld [vmem:[%s847_s1] sm:$0xff] }
 0x30a   :  { %v229_v25 = vmul.f32 %v516_v22, %v228_v24 }
 0x30c   :  { %v255_v28 = vrot.slane %v229_v25, 4  ;;  %v234_v29 = vrot.slane %v229_v25, %v707_v27  ;;  %v117_v25 = vrot.slane %v620_v21, 1 }
 0x30e   :  { %256 = vrot.lane.b32.xlu0 %v255_v28, %s559_s20  ;;  %v235_v30 = vmul.f32 %v234_v29, %v702_v20  ;;  %v219_v28 = vrot.slane %v675_v59, 3  ;;  %v168_v29 = vrot.slane %v647_v40, 2  ;;  %v564_v59 = vmov 7   ;;  %v15_v40 = vld [vmem:[%s846_s0] sm:$0xff] }
 0x310   :  { %v236_v31 = vsel %vm230_vm5, 0.0, %v235_v30 }
 0x311   :  { %239 = vperm.xlu1 %500, %v236_v31   ;;  %v270_v31 = vrot.slane %v702_v20, 4 }
 0x315   :  { %501 = vset.pattern.permute.xlu1 %v560_v32 }
 0x380   :  { %v257_v34 = vpop.permute.xlu0 %256 }
 0x381   :  { %472 = vpush %v257_v34 }
 0x390   :  { %v715_v35 = vpop.permute.xlu1 %239 }
 0x391   :  { %v246_v38 = vmul.f32 %v245_v36, %v715_v35 }
 0x393   :  { %v247_v39 = vsub.f32 %v702_v20, %v246_v38 }
 0x3b2   :  { %s721_s21 = spop %472 }
 0x3b3   :  { %v259_v41 = vstv %s721_s21 }
 0x3b4   :  { %v261_v42 = vmul.f32 %v259_v41, %v247_v39 }
 0x3b6   :  { %v264_v43 = vsel %vm230_vm5, %v261_v42, %v247_v39 }
 0x3b7   :  { %265 = vst.msk [vmem:[#allocation2] sm:$0xff] %vm24_vm0, %v264_v43 }
 0x3be   :  { %v275_v44 = vld [vmem:[#allocation2] sm:$0xff] }
 0x3bf   :  { %517 = vrcp.f32 %v275_v44  ;;  %v296_v61 = vrot.slane %v275_v44, %v730_v50  ;;  %v321_v30 = vrot.slane %v275_v44, 5 }
 0x3c9   :  { %v518_v46 = vpop.eup %517 }
 0x3ca   :  { %v278_v47 = vmul.f32 %v518_v46, %v275_v44 }
 0x3cc   :  { %v279_v48 = vsub.f32 2.0, %v278_v47 }
 0x3ce   :  { %v280_v49 = vmul.f32 %v518_v46, %v279_v48 }
 0x3d0   :  { %v306_v51 = vrot.slane %v280_v49, 5  ;;  %v285_v53 = vrot.slane %v280_v49, %v730_v50 }
 0x3d2   :  { %307 = vrot.lane.b32.xlu0 %v306_v51, %s561_s22  ;;  %v286_v54 = vmul.f32 %v285_v53, %v275_v44 }
 0x3d4   :  { %v287_v55 = vsel %vm281_vm6, 0.0, %v286_v54 }
 0x3d5   :  { %290 = vperm.xlu1 %501, %v287_v55  }
 0x3d9   :  { %502 = vset.pattern.permute.xlu1 %v562_v57 }
 0x444   :  { %v308_v58 = vpop.permute.xlu0 %307 }
 0x445   :  { %474 = vpush %v308_v58 }
 0x454   :  { %v737_v60 = vpop.permute.xlu1 %290 }
 0x455   :  { %v297_v62 = vmul.f32 %v296_v61, %v737_v60 }
 0x457   :  { %v298_v63 = vsub.f32 %v275_v44, %v297_v62 }
 0x476   :  { %s741_s23 = spop %474 }
 0x477   :  { %v310_v3 = vstv %s741_s23 }
 0x478   :  { %v312_v5 = vmul.f32 %v310_v3, %v298_v63 }
 0x47a   :  { %v315_v6 = vsel %vm281_vm6, %v312_v5, %v298_v63 }
 0x47b   :  { %316 = vst.msk [vmem:[#allocation2] sm:$0xff] %vm24_vm0, %v315_v6 }
 0x482   :  { %v326_v7 = vld [vmem:[#allocation2] sm:$0xff] }
 0x483   :  { %519 = vrcp.f32 %v326_v7  ;;  %v372_v21 = vrot.slane %v326_v7, 6  ;;  %v347_v53 = vrot.slane %v326_v7, %v750_v14 }
 0x48d   :  { %v520_v9 = vpop.eup %519 }
 0x48e   :  { %v329_v10 = vmul.f32 %v520_v9, %v326_v7 }
 0x490   :  { %v330_v12 = vsub.f32 2.0, %v329_v10 }
 0x492   :  { %v331_v13 = vmul.f32 %v520_v9, %v330_v12 }
 0x494   :  { %v357_v18 = vrot.slane %v331_v13, 6  ;;  %v336_v19 = vrot.slane %v331_v13, %v750_v14 }
 0x496   :  { %358 = vrot.lane.b32.xlu0 %v357_v18, %s563_s24  ;;  %v337_v22 = vmul.f32 %v336_v19, %v326_v7 }
 0x498   :  { %v338_v24 = vsel %vm332_vm7, 0.0, %v337_v22 }
 0x499   :  { %341 = vperm.xlu1 %502, %v338_v24  }
 0x49a   :  { %19 = vperm.xlu0 %503, %v16_v23  }
 0x49d   :  { %118 = vrot.lane.b32.xlu1 %v117_v25, %s553_s14 }
 0x49e   :  { %220 = vrot.lane.b32.xlu0 %v219_v28, %s557_s18  ;;  %505 = vset.pattern.permute.xlu1 %v551_v1 }
 0x49f   :  { %504 = vset.pattern.permute.xlu0 %v564_v59 }
 0x4a1   :  { %169 = vrot.lane.b32.xlu1 %v168_v29, %s555_s16 }
 0x4a2   :  { %322 = vrot.lane.b32.xlu0 %v321_v30, %s561_s22 }
 0x4a5   :  { %271 = vrot.lane.b32.xlu1 %v270_v31, %s559_s20 }
 0x4a9   :  { %373 = vrot.lane.b32.xlu1 %v372_v21, %s563_s24 }
 0x508   :  { %v359_v32 = vpop.permute.xlu0 %358 }
 0x509   :  { %476 = vpush %v359_v32 }
 0x519   :  { %v20_v34 = vpop.permute.xlu0 %19 }
 0x51a   :  { %v772_v36 = vsub.f32 %v15_v40, %v20_v34 }
 0x51c   :  { %v56_v20 = vrot.slane %v772_v36, %v599_v8 }
 0x51d   :  { %v221_v40 = vpop.permute.xlu0 %220 }
 0x51e   :  { %v57_v38 = vmul.f32 %v56_v20, %v610_v15 }
 0x520   :  { %v58_v39 = vsub.f32 %v772_v36, %v57_v38 }
 0x522   :  { %v68_v42 = vmul.f32 %v61_v17, %v58_v39  ;;  %v342_v17 = vpop.permute.xlu1 %341 }
 0x524   :  { %v69_v43 = vsel %vm35_vm1, %v68_v42, %v58_v39  ;;  %v323_v39 = vpop.permute.xlu0 %322 }
 0x525   :  { %v98_v44 = vrot.slane %v69_v43, %v625_v26  ;;  %v348_v26 = vmul.f32 %v347_v53, %v342_v17 }
 0x526   :  { %v119_v31 = vpop.permute.xlu1 %118 }
 0x527   :  { %v99_v46 = vmul.f32 %v98_v44, %v633_v33  ;;  %v349_v57 = vsub.f32 %v326_v7, %v348_v26  ;;  %v121_v59 = vmul.f32 %v119_v31, %v592_v2 }
 0x529   :  { %v100_v47 = vsub.f32 %v69_v43, %v99_v46 }
 0x52a   :  { %v170_v21 = vpop.permute.xlu1 %169 }
 0x52b   :  { %v113_v48 = vmul.f32 %v106_v37, %v100_v47  ;;  %v172_v32 = vmul.f32 %v170_v21, %v121_v59 }
 0x52d   :  { %v114_v49 = vsel %vm77_vm2, %v113_v48, %v100_v47  ;;  %v223_v34 = vmul.f32 %v221_v40, %v172_v32 }
 0x52e   :  { %v149_v8 = vrot.slane %v114_v49, %v652_v45  ;;  %v272_v20 = vpop.permute.xlu1 %271 }
 0x52f   :  { %v274_v38 = vmul.f32 %v272_v20, %v223_v34 }
 0x530   :  { %v150_v15 = vmul.f32 %v149_v8, %v661_v52 }
 0x531   :  { %v325_v42 = vmul.f32 %v323_v39, %v274_v38 }
 0x532   :  { %v151_v51 = vsub.f32 %v114_v49, %v150_v15  ;;  %v374_v43 = vpop.permute.xlu1 %373 }
 0x533   :  { %v376_v44 = vmul.f32 %v374_v43, %v325_v42 }
 0x534   :  { %v164_v54 = vmul.f32 %v157_v56, %v151_v51 }
 0x536   :  { %v165_v33 = vsel %vm128_vm3, %v164_v54, %v151_v51 }
 0x537   :  { %v200_v37 = vrot.slane %v165_v33, %v680_v0 }
 0x539   :  { %v201_v55 = vmul.f32 %v200_v37, %v688_v11 }
 0x53a   :  { %s797_s0 = spop %476 }
 0x53b   :  { %v202_v45 = vsub.f32 %v165_v33, %v201_v55  ;;  %v361_v52 = vstv %s797_s0 }
 0x53c   :  { %v363_v58 = vmul.f32 %v361_v52, %v349_v57 }
 0x53d   :  { %v215_v61 = vmul.f32 %v208_v16, %v202_v45 }
 0x53e   :  { %v366_v56 = vsel %vm332_vm7, %v363_v58, %v349_v57 }
 0x53f   :  { %v216_v62 = vsel %vm179_vm4, %v215_v61, %v202_v45  ;;  %367 = vst.msk [vmem:[#allocation2] sm:$0xff] %vm24_vm0, %v366_v56 }
 0x540   :  { %v251_v0 = vrot.slane %v216_v62, %v707_v27 }
 0x542   :  { %v252_v11 = vmul.f32 %v251_v0, %v715_v35 }
 0x544   :  { %v253_v63 = vsub.f32 %v216_v62, %v252_v11 }
 0x546   :  { %v266_v5 = vmul.f32 %v259_v41, %v253_v63  ;;  %v377_v6 = vld [vmem:[#allocation2] sm:$0xff] }
 0x547   :  { %v423_v7 = vrot.slane %v377_v6, 7  ;;  %521 = vrcp.f32 %v377_v6 }
 0x548   :  { %v267_v16 = vsel %vm230_vm5, %v266_v5, %v253_v63 }
 0x549   :  { %v302_v9 = vrot.slane %v267_v16, %v730_v50  ;;  %424 = vrot.lane.b32.xlu0 %v423_v7, %s565_s28  ;;  %v386_v50 = vsub.s32 7, %v595_v4 }
 0x54b   :  { %v303_v10 = vmul.f32 %v302_v9, %v737_v60  ;;  %v398_v53 = vrot.slane %v377_v6, %v386_v50 }
 0x54d   :  { %v304_v12 = vsub.f32 %v267_v16, %v303_v10 }
 0x54f   :  { %v317_v27 = vmul.f32 %v310_v3, %v304_v12 }
 0x551   :  { %v522_v13 = vpop.eup %521  ;;  %v318_v35 = vsel %vm281_vm6, %v317_v27, %v304_v12 }
 0x552   :  { %v353_v41 = vrot.slane %v318_v35, %v750_v14  ;;  %v380_v18 = vmul.f32 %v522_v13, %v377_v6 }
 0x554   :  { %v354_v19 = vmul.f32 %v353_v41, %v342_v17  ;;  %v381_v22 = vsub.f32 2.0, %v380_v18 }
 0x556   :  { %v355_v23 = vsub.f32 %v318_v35, %v354_v19  ;;  %v382_v24 = vmul.f32 %v522_v13, %v381_v22 }
 0x558   :  { %v368_v25 = vmul.f32 %v361_v52, %v355_v23  ;;  %v408_v28 = vrot.slane %v382_v24, 7  ;;  %v387_v29 = vrot.slane %v382_v24, %v386_v50 }
 0x55a   :  { %409 = vrot.lane.b32.xlu1 %v408_v28, %s565_s28  ;;  %v388_v60 = vmul.f32 %v387_v29, %v377_v6  ;;  %v369_v3 = vsel %vm332_vm7, %v368_v25, %v355_v23 }
 0x55b   :  { %v404_v30 = vrot.slane %v369_v3, %v386_v50 }
 0x55c   :  { %v389_v14 = vsel %vm383_vm8, 0.0, %v388_v60 }
 0x55d   :  { %392 = vperm.xlu0 %504, %v389_v14  }
 0x561   :  { %506 = vset.pattern.permute.xlu0 %v551_v1 }
 0x5bb   :  { %v425_v46 = vpop.permute.xlu0 %424 }
 0x5bc   :  { %v427_v47 = vmul.f32 %v425_v46, %v376_v44 }
 0x5be   :  { %523 = vlog2.f32 %v427_v47 }
 0x5c8   :  { %v524_v48 = vpop.eup %523 }
 0x5c9   :  { %v437_v49 = vmul.f32 0.6931472, %v524_v48 }
 0x5cb   :  { %v439_v8 = vadd.f32 14.703016, %v437_v49 }
 0x5cc   :  { %v410_v1 = vpop.permute.xlu1 %409 }
 0x5cd   :  { %478 = vpush %v410_v1  ;;  %v440_v15 = vmul.f32 0.5, %v439_v8 }
 0x5cf   :  { %443 = vperm.xlu1 %505, %v440_v15  }
 0x5dc   :  { %v393_v2 = vpop.permute.xlu0 %392 }
 0x5dd   :  { %v405_v51 = vmul.f32 %v404_v30, %v393_v2  ;;  %v399_v54 = vmul.f32 %v398_v53, %v393_v2 }
 0x5df   :  { %v406_v17 = vsub.f32 %v369_v3, %v405_v51  ;;  %v400_v26 = vsub.f32 %v377_v6, %v399_v54 }
 0x5fe   :  { %s479_s29 = spop %478 }
 0x5ff   :  { %v412_v33 = vstv %s479_s29 }
 0x600   :  { %v414_v37 = vmul.f32 %v412_v33, %v400_v26  ;;  %v419_v57 = vmul.f32 %v412_v33, %v406_v17 }
 0x602   :  { %v417_v55 = vsel %vm383_vm8, %v414_v37, %v400_v26  ;;  %v420_v45 = vsel %vm383_vm8, %v419_v57, %v406_v17 }
 0x603   :  { %418 = vst.msk [vmem:[#allocation2] sm:$0xff] %vm24_vm0, %v417_v55  ;;  %v429_v52 = vmul.f32 %v420_v45, %v772_v36 }
 0x605   :  { %v430_v58 = vrot.slane %v429_v52, 4 }
 0x607   :  { %v431_v61 = vadd.f32 %v430_v58, %v429_v52 }
 0x609   :  { %v432_v56 = vrot.slane %v431_v61, 2 }
 0x60b   :  { %v433_v62 = vadd.f32 %v432_v56, %v431_v61 }
 0x60d   :  { %v434_v0 = vrot.slane %v433_v62, 1 }
 0x60f   :  { %v435_v11 = vadd.f32 %v434_v0, %v433_v62 }
 0x611   :  { %v438_v63 = vmul.f32 -0.5, %v435_v11 }
 0x64e   :  { %v444_v5 = vpop.permute.xlu1 %443 }
 0x64f   :  { %v446_v6 = vsub.f32 %v438_v63, %v444_v5 }
 0x651   :  { %v447_v7 = vmul.f32 1.442695, %v446_v6 }
 0x653   :  { %525 = vpow2.f32 %v447_v7 }
 0x65d   :  { %v526_v16 = vpop.eup %525 }
 0x65e   :  { %449 = vst [vmem:[#allocation4] sm:$0x1] %v526_v16 }
 0x65f   :  { %538 = shalt.err (!%p535_p4)
}
 0x660   :  { %s539_s9 = scalar_lea.hbm %s849_s3, 16 }
 0x661   :  { %p540_p5 = scmp.ne.s32.totalorder %s849_s3, %s539_s9  ;;  %p543_p6 = scmp.lt.u32.totalorder %s539_s9, %s849_s3 }
 0x663   :  { %p545_p7 = pnand %p543_p6, %p540_p5 }
 0x665   :  { %548 = shalt.err (!%p545_p7)
}
 0x666   :  { %459 = dma.vmem_to_hbm [thread:$0]  %s457_s4, 16, %s849_s3, [#allocation5]  }
 0x667   :  { %549 = dma.done.wait [#allocation5], 16  }
 0x668   :  { %550 = vsyncadd [#allocation5], 4294967280 }
 0x669   :  { %463 = vsyncpa [#allocation5], 1 }

</bundles_post_ra>
